<compile_context>
chip_gen: v5e
topology: v5e:2x2
jax: 0.10.0
libtpu: 0.0.40
codegen_flags: <defaults>
</compile_context>

<pallas_src>
import math
from functools import partial

import jax
import jax.numpy as jnp
from jax.experimental import pallas as pl
from jax.experimental.pallas import tpu as pltpu


def _round_up(x, m):
    return ((x + m - 1) // m) * m


def _edgewise_energy_sum_kernel(centers_ref, eng_ref, out_ref, *, atom_tile, factor):
    e_step = pl.program_id(1)

    # Zero this atom tile's resident accumulator on the first edge tile.
    @pl.when(e_step == 0)
    def _():
        out_ref[...] = jnp.zeros_like(out_ref)

    centers = centers_ref[...]            # (TE, 1) int32, edges on sublanes
    eng = eng_ref[...]                    # (1, TE) f32,   edges on lanes

    te = centers.shape[0]
    atom_base = pl.program_id(0) * atom_tile
    atom_ids = atom_base + jax.lax.broadcasted_iota(jnp.int32, (te, atom_tile), 1)

    # (TE, AT) one-hot membership. Out-of-range centers (including the padded
    # edges, whose center == N_pad) match no atom and are silently dropped.
    one_hot = (centers == atom_ids).astype(jnp.float32)

    # MXU matmul: (1, TE) @ (TE, AT) -> (1, AT), already lane-dense.
    out_ref[...] += jnp.dot(eng, one_hot, preferred_element_type=jnp.float32)

    if factor is not None:
        @pl.when(e_step == pl.num_programs(1) - 1)
        def _():
            out_ref[...] = out_ref[...] * jnp.float32(factor)


def edgewise_energy_sum(edge_index, edge_energy, num_atoms,
                        avg_num_neighbors=None, normalize_edge_energy_sum=True,
                        edge_tile=512, atom_tile=256):
    """JAX/Pallas equivalent of EdgewiseEnergySum.forward.

    edge_index:  int [2, E]   (row 0 = edge_center; row 1 unused by forward)
    edge_energy: f32 [E, 1]   ('0e' scalar per edge)
    returns:     f32 [num_atoms, 1]
    """
    factor = None
    if normalize_edge_energy_sum and avg_num_neighbors is not None:
        factor = 1.0 / math.sqrt(avg_num_neighbors)

    num_edges = int(edge_energy.shape[0])
    if num_edges == 0:
        # Empty grid would leave the accumulator uninitialized; short-circuit.
        return jnp.zeros((num_atoms, 1), jnp.float32)

    # Atoms on the lane axis: 128-aligned tile, output padded to a tile multiple.
    atom_tile = max(128, _round_up(min(atom_tile, _round_up(num_atoms, 128)), 128))
    n_pad = _round_up(max(num_atoms, 1), atom_tile)

    # Edge tiling: large tiles, multiple of 8 sublanes, capped by E.
    edge_tile = _round_up(max(8, min(edge_tile, num_edges)), 8)
    e_pad = _round_up(num_edges, edge_tile)

    # Pad edges with an out-of-range center and zero energy (contribute nothing).
    edge_center = edge_index[0].astype(jnp.int32)
    edge_center = jnp.pad(edge_center, (0, e_pad - num_edges), constant_values=n_pad)
    eng = edge_energy.reshape(num_edges).astype(jnp.float32)
    eng = jnp.pad(eng, (0, e_pad - num_edges))

    centers_col = edge_center[:, None]                         # (E_pad, 1)
    eng_rows = eng.reshape(e_pad // edge_tile, edge_tile)      # lane-dense rows

    kernel = partial(_edgewise_energy_sum_kernel, atom_tile=atom_tile, factor=factor)
    grid = (n_pad // atom_tile, e_pad // edge_tile)

    out = pl.pallas_call(
        kernel,
        out_shape=jax.ShapeDtypeStruct((1, n_pad), jnp.float32),
        grid_spec=pltpu.PrefetchScalarGridSpec(
            num_scalar_prefetch=0,
            grid=grid,
            in_specs=[
                pl.BlockSpec((edge_tile, 1), lambda a, e: (e, 0)),   # edge centers
                pl.BlockSpec((1, edge_tile), lambda a, e: (e, 0)),   # edge energies
            ],
            # Resident lane-dense accumulator per atom tile (constant over edge axis).
            out_specs=pl.BlockSpec((1, atom_tile), lambda a, e: (0, a)),
        ),
        compiler_params=pltpu.CompilerParams(
            dimension_semantics=("parallel", "arbitrary"),
        ),
    )(centers_col, eng_rows)

    return out[0, :num_atoms][:, None]


if __name__ == "__main__":
    key = jax.random.PRNGKey(0)
    k1, k2, k3 = jax.random.split(key, 3)

    # Case 1: normalized sum (matches the module with avg_num_neighbors set).
    num_atoms = 8
    num_edges = 64
    avg_num_neighbors = float(num_edges) / float(num_atoms)

    edge_center = jax.random.randint(k1, (num_edges,), 0, num_atoms, dtype=jnp.int32)
    # edge_index[1] (neighbors) is unused by the forward but kept for fidelity.
    edge_neighbor = jax.random.randint(k2, (num_edges,), 0, num_atoms, dtype=jnp.int32)
    edge_index = jnp.stack([edge_center, edge_neighbor], axis=0)            # [2, E]
    edge_energy = jax.random.normal(k3, (num_edges, 1), dtype=jnp.float32)  # [E, 1]

    atom_energy = edgewise_energy_sum(
        edge_index, edge_energy, num_atoms,
        avg_num_neighbors=avg_num_neighbors,
        normalize_edge_energy_sum=True,
    )
    atom_energy = jax.block_until_ready(atom_energy)

    factor = 1.0 / math.sqrt(avg_num_neighbors)
    ref = jax.ops.segment_sum(edge_energy[:, 0] * factor, edge_center,
                              num_segments=num_atoms)[:, None]
    assert atom_energy.shape == (num_atoms, 1)
    assert jnp.allclose(atom_energy, ref, atol=1e-5, rtol=1e-5)

    # Case 2: non-multiple edge count + no normalization (exercises edge padding).
    n2, e2 = 10, 50
    c2 = jax.random.randint(k2, (e2,), 0, n2, dtype=jnp.int32)
    idx2 = jnp.stack([c2, c2], axis=0)
    eng2 = jax.random.normal(k1, (e2, 1), dtype=jnp.float32)
    out2 = jax.block_until_ready(
        edgewise_energy_sum(idx2, eng2, n2, avg_num_neighbors=None))
    ref2 = jax.ops.segment_sum(eng2[:, 0], c2, num_segments=n2)[:, None]
    assert out2.shape == (n2, 1)
    assert jnp.allclose(out2, ref2, atol=1e-5, rtol=1e-5)

    print("KERNEL_OK")
</pallas_src>

<mosaic_0001>
module attributes {stable_mosaic.version = 11 : i64} {
  func.func @_edgewise_energy_sum_kernel(%arg0: i32, %arg1: i32, %arg2: memref<64x1xi32, #tpu.memory_space<vmem>>, %arg3: memref<1x64xf32, #tpu.memory_space<vmem>>, %arg4: memref<1x128xf32, #tpu.memory_space<vmem>>) attributes {dimension_semantics = [#tpu.dimension_semantics<parallel>, #tpu.dimension_semantics<arbitrary>], iteration_bounds = array<i64: 1, 1>, scalar_prefetch = 0 : i64, scratch_operands = 0 : i64, tpu.core_type = #tpu.core_type<tc>, window_params = [{transform_indices = @transform_0, window_bounds = array<i64: 64, 1>}, {transform_indices = @transform_1, window_bounds = array<i64: 1, 64>}, {transform_indices = @transform_2, window_bounds = array<i64: 1, 128>}]} {
    %c0_i32 = arith.constant 0 : i32
    %0 = arith.cmpi eq, %arg1, %c0_i32 : i32
    %1 = arith.extui %0 : i1 to i32
    %c0_i32_0 = arith.constant 0 : i32
    %2 = arith.cmpi ne, %1, %c0_i32_0 : i32
    scf.if %2 {
      %cst_10 = arith.constant 0.000000e+00 : f32
      %20 = vector.broadcast %cst_10 : f32 to vector<1x128xf32>
      %c0_11 = arith.constant 0 : index
      %c0_12 = arith.constant 0 : index
      %21 = vector.load %arg4[%c0_11, %c0_12] : memref<1x128xf32, #tpu.memory_space<vmem>>, vector<1x128xf32>
      tpu.vector_store %arg4[%c0_11, %c0_12], %20 {strides = array<i32>} : memref<1x128xf32, #tpu.memory_space<vmem>>, vector<1x128xf32>,
    } else {
    }
    %c0 = arith.constant 0 : index
    %c0_1 = arith.constant 0 : index
    %3 = vector.load %arg2[%c0, %c0_1] : memref<64x1xi32, #tpu.memory_space<vmem>>, vector<64x1xi32>
    %c0_2 = arith.constant 0 : index
    %c0_3 = arith.constant 0 : index
    %4 = vector.load %arg3[%c0_2, %c0_3] : memref<1x64xf32, #tpu.memory_space<vmem>>, vector<1x64xf32>
    %c128_i32 = arith.constant 128 : i32
    %5 = arith.muli %arg0, %c128_i32 : i32
    %6 = tpu.iota {dimensions = array<i32: 1>} : vector<64x128xi32>
    %7 = vector.broadcast %5 : i32 to vector<64x128xi32>
    %8 = arith.addi %7, %6 : vector<64x128xi32>
    %9 = vector.broadcast %3 : vector<64x1xi32> to vector<64x128xi32>
    %10 = arith.cmpi eq, %9, %8 : vector<64x128xi32>
    %11 = arith.extui %10 : vector<64x128xi1> to vector<64x128xi32>
    %12 = arith.sitofp %11 : vector<64x128xi32> to vector<64x128xf32>
    %c0_4 = arith.constant 0 : index
    %c0_5 = arith.constant 0 : index
    %13 = vector.load %arg4[%c0_4, %c0_5] : memref<1x128xf32, #tpu.memory_space<vmem>>, vector<1x128xf32>
    %cst = arith.constant dense<0.000000e+00> : vector<1x128xf32>
    %14 = tpu.matmul %4, %12, %cst {dimension_numbers = #tpu.dot_dimension_numbers<[1], [0], [0], [1], [0, 0, 1, 1], [], []>} : vector<1x64xf32>, vector<64x128xf32>, vector<1x128xf32> -> vector<1x128xf32>
    %15 = arith.addf %13, %14 : vector<1x128xf32>
    %c0_6 = arith.constant 0 : index
    %c0_7 = arith.constant 0 : index
    %16 = vector.load %arg4[%c0_6, %c0_7] : memref<1x128xf32, #tpu.memory_space<vmem>>, vector<1x128xf32>
    tpu.vector_store %arg4[%c0_6, %c0_7], %15 {strides = array<i32>} : memref<1x128xf32, #tpu.memory_space<vmem>>, vector<1x128xf32>,
    %c0_i32_8 = arith.constant 0 : i32
    %17 = arith.cmpi eq, %arg1, %c0_i32_8 : i32
    %18 = arith.extui %17 : i1 to i32
    %c0_i32_9 = arith.constant 0 : i32
    %19 = arith.cmpi ne, %18, %c0_i32_9 : i32
    scf.if %19 {
      %c0_10 = arith.constant 0 : index
      %c0_11 = arith.constant 0 : index
      %20 = vector.load %arg4[%c0_10, %c0_11] : memref<1x128xf32, #tpu.memory_space<vmem>>, vector<1x128xf32>
      %cst_12 = arith.constant 0.353553385 : f32
      %21 = vector.broadcast %cst_12 : f32 to vector<1x128xf32>
      %22 = arith.mulf %20, %21 : vector<1x128xf32>
      %c0_13 = arith.constant 0 : index
      %c0_14 = arith.constant 0 : index
      %23 = vector.load %arg4[%c0_13, %c0_14] : memref<1x128xf32, #tpu.memory_space<vmem>>, vector<1x128xf32>
      tpu.vector_store %arg4[%c0_13, %c0_14], %22 {strides = array<i32>} : memref<1x128xf32, #tpu.memory_space<vmem>>, vector<1x128xf32>,
    } else {
    }
    return
  }
  func.func @transform_0(%arg0: i32, %arg1: i32) -> (i32, i32) {
    %c0_i32 = arith.constant 0 : i32
    %c0_i32_0 = arith.constant 0 : i32
    return %arg1, %c0_i32 : i32, i32
  }
  func.func @transform_1(%arg0: i32, %arg1: i32) -> (i32, i32) {
    %c0_i32 = arith.constant 0 : i32
    %c0_i32_0 = arith.constant 0 : i32
    return %arg1, %c0_i32 : i32, i32
  }
  func.func @transform_2(%arg0: i32, %arg1: i32) -> (i32, i32) {
    %c0_i32 = arith.constant 0 : i32
    %c0_i32_0 = arith.constant 0 : i32
    return %c0_i32, %arg0 : i32, i32
  }
}

</mosaic_0001>

<bundles_post_ra>
// kernel: tpu_custom_call.1
= control target key start
LH: loop header
LB: loop body
LE: loop exit
PB: predicated region body
PF: predicated region fallthrough
CT: control target
= control target key end

     0   :  { %v178_v2 = vmov 0   ;;  %s227_s0 = inlined_call_operand.vmem [shape: s32[64,1], index: 0, kind: input, shape index: {}]   ;;  %s228_s1 = inlined_call_operand.vmem [shape: f32[1,64], index: 1, kind: input, shape index: {}]   ;;  %s229_s2 = inlined_call_operand.hbm [shape: f32[1,128], index: 2, kind: output, shape index: {}]  }
   0x1   :  { %v24_v0 = vld [vmem:[%s227_s0 + $0x38] sm:$0xff]  ;;  %v22_v1 = vld [vmem:[%s227_s0 + $0x28] sm:$0xff]  ;;  %150 = vset.pattern.permute.xlu1 %v178_v2  ;;  %149 = vset.pattern.permute.xlu0 %v178_v2 }
   0x2   :  { %53 = vperm.xlu0 %149, %v24_v0   ;;  %47 = vperm.xlu1 %150, %v22_v1   ;;  %v20_v3 = vld [vmem:[%s227_s0 + $0x18] sm:$0xff] }
   0x3   :  { %7 = vsyncpa [#allocation3], 0  ;;  %151 = vset.pattern.permute.xlu2 %v178_v2  ;;  %v23_v4 = vld [vmem:[%s227_s0 + $0x30] sm:$0xff]  ;;  %v21_v5 = vld [vmem:[%s227_s0 + $0x20] sm:$0xff]  ;;  %v179_v9 = vmov 0.0   ;;  %v27_v10 = vlaneseq  ;;  %v180_v14 = vmov 1.0  }
   0x4   :  { %41 = vperm.xlu2 %151, %v20_v3   ;;  %v19_v6 = vld [vmem:[%s227_s0 + $0x10] sm:$0xff]  ;;  %v18_v7 = vld [vmem:[%s227_s0 + $0x8] sm:$0xff]  ;;  %v17_v8 = vld [vmem:[%s227_s0] sm:$0xff]  ;;  %16 = vst [vmem:[#allocation2] sm:$0x1] %v179_v9  ;;  %vm80_vm7 = vcmask 523264  }
   0x5   :  { %v28_v11 = vand.u32 127, %v27_v10  ;;  %v25_v21 = vld [vmem:[%s228_s1] sm:$0x1]  ;;  %s181_s26 = smov [#allocation2]   ;;  %s119_s30 = sshll.u32 %s229_s2, 4  ;;  %s120_s30 = int_to_ptr.hbm [resolvable:$true] %s119_s30 }
   0x6   :  { %s117_s27 = sshll.u32 %s181_s26, 4  ;;  %s118_s27 = int_to_ptr.vmem [resolvable:$true] %s117_s27 }
   0xa   :  { %50 = vperm.xlu0 %149, %v23_v4   ;;  %44 = vperm.xlu1 %150, %v21_v5  }
   0xb   :  { %v79_v22 = vld [vmem:[#allocation2] sm:$0x1] }
   0xc   :  { %38 = vperm.xlu2 %151, %v19_v6  }
  0x12   :  { %35 = vperm.xlu0 %149, %v18_v7   ;;  %32 = vperm.xlu1 %150, %v17_v8  }
  0x5e   :  { %v42_v15 = vpop.permute.xlu2 %41 }
  0x5f   :  { %vm58_vm4 = vcmp.eq.s32.totalorder %v42_v15, %v28_v11 }
  0x66   :  { %v39_v18 = vpop.permute.xlu2 %38 }
  0x67   :  { %vm57_vm5 = vcmp.eq.s32.totalorder %v39_v18, %v28_v11 }
  0x74   :  { %v54_v12 = vpop.permute.xlu0 %53  ;;  %v48_v13 = vpop.permute.xlu1 %47 }
  0x75   :  { %vm62_vm0 = vcmp.eq.s32.totalorder %v54_v12, %v28_v11  ;;  %vm60_vm2 = vcmp.eq.s32.totalorder %v48_v13, %v28_v11 }
  0x76   :  { %136 = vmatpush.msk.msra.mxu0 %vm62_vm0, %v180_v14 }
  0x7c   :  { %v51_v16 = vpop.permute.xlu0 %50  ;;  %v45_v17 = vpop.permute.xlu1 %44 }
  0x7d   :  { %vm61_vm1 = vcmp.eq.s32.totalorder %v51_v16, %v28_v11  ;;  %vm59_vm3 = vcmp.eq.s32.totalorder %v45_v17, %v28_v11 }
  0x7e   :  { %137 = vmatpush.msk.msra.mxu0 %vm61_vm1, %v180_v14 }
  0x80   :  { %138 = vmatpush.msk.msra.mxu0 %vm60_vm2, %v180_v14 }
  0x82   :  { %139 = vmatpush.msk.msra.mxu0 %vm59_vm3, %v180_v14 }
  0x84   :  { %140 = vmatpush.msk.msra.mxu0 %vm58_vm4, %v180_v14  ;;  %v36_v19 = vpop.permute.xlu0 %35  ;;  %v33_v20 = vpop.permute.xlu1 %32 }
  0x85   :  { %vm56_vm6 = vcmp.eq.s32.totalorder %v36_v19, %v28_v11  ;;  %vm55_vm8 = vcmp.eq.s32.totalorder %v33_v20, %v28_v11 }
  0x86   :  { %141 = vmatpush.msk.msra.mxu0 %vm57_vm5, %v180_v14 }
  0x88   :  { %142 = vmatpush.msk.msra.mxu0 %vm56_vm6, %v180_v14 }
  0x8a   :  { %143 = vmatpush.msk.msra.mxu0 %vm55_vm8, %v180_v14 }
  0x8b   :  { %144 = vmatmul.msk.f32.vlgmr.msra.gmra.mxu0 %vm80_vm7, %v25_v21 }
 0x108   :  { %v101_v23 = vpop.f32.mrf.mxu0 }
 0x109   :  { %v104_v24 = vadd.f32 %v101_v23, %v79_v22 }
 0x10b   :  { %105 = vst [vmem:[#allocation2] sm:$0x1] %v104_v24 }
 0x112   :  { %v109_v25 = vld [vmem:[#allocation2] sm:$0x1] }
 0x113   :  { %v110_v26 = vmul.f32 0.35355338, %v109_v25 }
 0x115   :  { %111 = vst [vmem:[#allocation2] sm:$0x1] %v110_v26 }
 0x116   :  { %122 = dma.vmem_to_hbm [thread:$0]  %s118_s27, 16, %s120_s30, [#allocation3]  }
 0x117   :  { %176 = dma.done.wait [#allocation3], 16  }
 0x118   :  { %177 = vsyncadd [#allocation3], 4294967280 }
 0x119   :  { %127 = vsyncpa [#allocation3], 1 }

</bundles_post_ra>
